<compile_context>
chip_gen: v5e
topology: v5e:2x2
jax: 0.10.0
libtpu: 0.0.40
codegen_flags: <defaults>
</compile_context>

<pallas_src>
import jax
import jax.numpy as jnp
import numpy as np
from jax.experimental import pallas as pl
from jax.experimental.pallas import tpu as pltpu


# --------------------------------------------------------------- kernel ------
def normalize_kernel(x_ref, mean_ref, std_ref, o_ref):
    # x_ref: (tile_rows, H*W)   mean_ref/std_ref: (tile_rows, 1)
    # Pure VPU elementwise: subtract + divide, lane-broadcast of the per-row
    # (per-channel) mean/std.
    o_ref[...] = (x_ref[...] - mean_ref[...]) / std_ref[...]


# --------------------------------------------------------------- wrapper -----
def normalize(x, mean, std, *, row_tile=512):
    """(x - mean[None,:,None,None]) / std[None,:,None,None] for NCHW x."""
    b, c, h, w = x.shape
    rows, cols = b * c, h * w

    # channels-last-free flattening: tokens = (b, c) rows, lanes = h*w pixels.
    x2d = x.reshape(rows, cols)
    mean_rows = jnp.tile(mean.reshape(-1).astype(x.dtype), b).reshape(rows, 1)
    std_rows = jnp.tile(std.reshape(-1).astype(x.dtype), b).reshape(rows, 1)

    # Single whole-array block unless the row count is big enough (and
    # sublane-aligned) to be worth tiling; this problem is launch-bound.
    if rows % 8 == 0 and rows > row_tile:
        tile = row_tile
    else:
        tile = rows
    grid = (rows // tile,)

    out2d = pl.pallas_call(
        normalize_kernel,
        out_shape=jax.ShapeDtypeStruct((rows, cols), x.dtype),
        grid=grid,
        in_specs=[
            pl.BlockSpec((tile, cols), lambda i: (i, 0)),
            pl.BlockSpec((tile, 1), lambda i: (i, 0)),
            pl.BlockSpec((tile, 1), lambda i: (i, 0)),
        ],
        out_specs=pl.BlockSpec((tile, cols), lambda i: (i, 0)),
        compiler_params=pltpu.CompilerParams(
            dimension_semantics=("parallel",)),
    )(x2d, mean_rows, std_rows)

    return out2d.reshape(b, c, h, w)


# ------------------------------------------------------- pure-JAX reference --
def reference_forward(x, mean, std):
    return (x - mean[None, :, None, None]) / std[None, :, None, None]


# ------------------------------------------------------------------- main ----
if __name__ == "__main__":
    key = jax.random.PRNGKey(0)

    B, C, H, W = 2, 3, 32, 32           # small RGB-image-like input
    x = jax.random.normal(key, (B, C, H, W), jnp.float32)
    mean = jnp.array([0.485, 0.456, 0.406], jnp.float32)   # module defaults
    std = jnp.array([0.229, 0.224, 0.225], jnp.float32)

    out = normalize(x, mean, std)
    out = jax.block_until_ready(out)
    assert out.shape == (B, C, H, W), out.shape

    ref = jax.block_until_ready(reference_forward(x, mean, std))
    np.testing.assert_allclose(np.asarray(out), np.asarray(ref),
                               rtol=1e-6, atol=1e-6)

    print("KERNEL_OK")
</pallas_src>

<mosaic_0001>
module attributes {stable_mosaic.version = 11 : i64} {
  func.func @normalize_kernel(%arg0: i32, %arg1: memref<6x1024xf32, #tpu.memory_space<vmem>>, %arg2: memref<6x1xf32, #tpu.memory_space<vmem>>, %arg3: memref<6x1xf32, #tpu.memory_space<vmem>>, %arg4: memref<6x1024xf32, #tpu.memory_space<vmem>>) attributes {dimension_semantics = [#tpu.dimension_semantics<parallel>], iteration_bounds = array<i64: 1>, scalar_prefetch = 0 : i64, scratch_operands = 0 : i64, tpu.core_type = #tpu.core_type<tc>, window_params = [{transform_indices = @transform_0, window_bounds = array<i64: 6, 1024>}, {transform_indices = @transform_1, window_bounds = array<i64: 6, 1>}, {transform_indices = @transform_2, window_bounds = array<i64: 6, 1>}, {transform_indices = @transform_3, window_bounds = array<i64: 6, 1024>}]} {
    %c0 = arith.constant 0 : index
    %c0_0 = arith.constant 0 : index
    %0 = vector.load %arg1[%c0, %c0_0] : memref<6x1024xf32, #tpu.memory_space<vmem>>, vector<6x1024xf32>
    %c0_1 = arith.constant 0 : index
    %c0_2 = arith.constant 0 : index
    %1 = vector.load %arg2[%c0_1, %c0_2] : memref<6x1xf32, #tpu.memory_space<vmem>>, vector<6x1xf32>
    %2 = vector.broadcast %1 : vector<6x1xf32> to vector<6x1024xf32>
    %3 = arith.subf %0, %2 : vector<6x1024xf32>
    %c0_3 = arith.constant 0 : index
    %c0_4 = arith.constant 0 : index
    %4 = vector.load %arg3[%c0_3, %c0_4] : memref<6x1xf32, #tpu.memory_space<vmem>>, vector<6x1xf32>
    %5 = vector.broadcast %4 : vector<6x1xf32> to vector<6x1024xf32>
    %6 = arith.divf %3, %5 : vector<6x1024xf32>
    %c0_5 = arith.constant 0 : index
    %c0_6 = arith.constant 0 : index
    %7 = vector.load %arg4[%c0_5, %c0_6] : memref<6x1024xf32, #tpu.memory_space<vmem>>, vector<6x1024xf32>
    tpu.vector_store %arg4[%c0_5, %c0_6], %6 {strides = array<i32>} : memref<6x1024xf32, #tpu.memory_space<vmem>>, vector<6x1024xf32>,
    return
  }
  func.func @transform_0(%arg0: i32) -> (i32, i32) {
    %c0_i32 = arith.constant 0 : i32
    %c0_i32_0 = arith.constant 0 : i32
    return %arg0, %c0_i32 : i32, i32
  }
  func.func @transform_1(%arg0: i32) -> (i32, i32) {
    %c0_i32 = arith.constant 0 : i32
    %c0_i32_0 = arith.constant 0 : i32
    return %arg0, %c0_i32 : i32, i32
  }
  func.func @transform_2(%arg0: i32) -> (i32, i32) {
    %c0_i32 = arith.constant 0 : i32
    %c0_i32_0 = arith.constant 0 : i32
    return %arg0, %c0_i32 : i32, i32
  }
  func.func @transform_3(%arg0: i32) -> (i32, i32) {
    %c0_i32 = arith.constant 0 : i32
    %c0_i32_0 = arith.constant 0 : i32
    return %arg0, %c0_i32 : i32, i32
  }
}

</mosaic_0001>

<bundles_post_ra>
// kernel: tpu_custom_call.1
= control target key start
LH: loop header
LB: loop body
LE: loop exit
PB: predicated region body
PF: predicated region fallthrough
CT: control target
= control target key end

     0   :  { %8 = vsyncpa [#allocation3], 0  ;;  %s197_s0 = inlined_call_operand.hbm [shape: f32[6,1024], index: 0, kind: input, shape index: {}]   ;;  %s198_s1 = inlined_call_operand.vmem [shape: f32[6,1], index: 1, kind: input, shape index: {}]   ;;  %s199_s2 = inlined_call_operand.vmem [shape: f32[6,1], index: 2, kind: input, shape index: {}]   ;;  %s200_s3 = inlined_call_operand.hbm [shape: f32[6,1024], index: 3, kind: output, shape index: {}]  }
   0x1   :  { %9 = vsyncpa [#allocation4], 0  ;;  %s15_s14 = sshll.u32 %s197_s0, 4  ;;  %s162_s15 = smov [#allocation2]   ;;  %s16_s14 = int_to_ptr.hbm [resolvable:$true] %s15_s14 }
   0x2   :  { %s17_s16 = sshll.u32 %s162_s15, 4  ;;  %s18_s16 = int_to_ptr.vmem [resolvable:$true] %s17_s16 }
   0x3   :  { %20 = dma.hbm_to_vmem [thread:$0]  %s16_s14, 1024, %s18_s16, [#allocation3]  }
   0x4   :  { %158 = dma.done.wait [#allocation3], 1024  }
   0x5   :  { %159 = vsyncadd [#allocation3], 4294966272  ;;  %v163_v0 = vmov 0   ;;  %v51_v1 = vld [vmem:[%s199_s2] sm:$0x3f]  ;;  %s164_s0 = smov [#allocation5]  }
   0x6   :  { %107 = vset.pattern.permute.xlu0 %v163_v0  ;;  %v37_v2 = vld [vmem:[%s198_s1] sm:$0x3f]  ;;  %v30_v12 = vld [vmem:[#allocation2 + $0x8] sm:$0x3f]  ;;  %v31_v13 = vld [vmem:[#allocation2 + $0x10] sm:$0x3f] }
   0x7   :  { %54 = vperm.xlu0 %107, %v51_v1   ;;  %v29_v11 = vld [vmem:[#allocation2] sm:$0x3f]  ;;  %v32_v15 = vld [vmem:[#allocation2 + $0x18] sm:$0x3f]  ;;  %v34_v19 = vld [vmem:[#allocation2 + $0x28] sm:$0x3f] }
   0x8   :  { %v33_v17 = vld [vmem:[#allocation2 + $0x20] sm:$0x3f]  ;;  %v35_v24 = vld [vmem:[#allocation2 + $0x30] sm:$0x3f]  ;;  %v36_v26 = vld [vmem:[#allocation2 + $0x38] sm:$0x3f] }
   0x9   :  { %s92_s1 = sshll.u32 %s164_s0, 4  ;;  %s94_s22 = sshll.u32 %s200_s3, 4  ;;  %s93_s1 = int_to_ptr.vmem [resolvable:$true] %s92_s1  ;;  %s95_s22 = int_to_ptr.hbm [resolvable:$true] %s94_s22 }
   0xf   :  { %40 = vperm.xlu0 %107, %v37_v2  }
  0x79   :  { %v55_v3 = vpop.permute.xlu0 %54 }
  0x7a   :  { %108 = vrcp.f32 %v55_v3  ;;  %v66_v7 = vand.u32 2147483647, %v55_v3  ;;  %v68_v8 = vand.u32 2147483648, %v55_v3  ;;  %vm62_vm1 = vweird.f32 %v55_v3 }
  0x7c   :  { %vm67_vm3 = vcmp.eq.f32.partialorder %v66_v7, 8.507059e+37  ;;  %v69_v16 = vor.u32 1.1754944e-38, %v68_v8 }
  0x80   :  { %v109_v4 = vpop.eup %108 }
  0x81   :  { %v58_v5 = vmul.f32 %v109_v4, %v55_v3  ;;  %vm63_vm0 = vweird.f32 %v109_v4  ;;  %v41_v10 = vpop.permute.xlu0 %40 }
  0x82   :  { %vm64_vm2 = vmor %vm62_vm1, %vm63_vm0  ;;  %v43_v20 = vsub.f32 %v29_v11, %v41_v10  ;;  %v44_v21 = vsub.f32 %v30_v12, %v41_v10  ;;  %v45_v22 = vsub.f32 %v31_v13, %v41_v10  ;;  %v46_v25 = vsub.f32 %v32_v15, %v41_v10 }
  0x83   :  { %v59_v6 = vsub.f32 1.0, %v58_v5  ;;  %v47_v27 = vsub.f32 %v33_v17, %v41_v10  ;;  %v48_v31 = vsub.f32 %v34_v19, %v41_v10  ;;  %v49_v33 = vsub.f32 %v35_v24, %v41_v10 }
  0x84   :  { %v50_v35 = vsub.f32 %v36_v26, %v41_v10 }
  0x85   :  { %v60_v9 = vmul.f32 %v109_v4, %v59_v6 }
  0x87   :  { %v61_v14 = vadd.f32 %v109_v4, %v60_v9 }
  0x89   :  { %v65_v18 = vsel %vm64_vm2, %v109_v4, %v61_v14 }
  0x8a   :  { %v70_v23 = vsel %vm67_vm3, %v69_v16, %v65_v18 }
  0x8b   :  { %v71_v28 = vmul.f32 %v70_v23, %v43_v20  ;;  %v72_v29 = vmul.f32 %v70_v23, %v44_v21  ;;  %v73_v30 = vmul.f32 %v70_v23, %v45_v22  ;;  %v74_v32 = vmul.f32 %v70_v23, %v46_v25 }
  0x8c   :  { %v75_v34 = vmul.f32 %v70_v23, %v47_v27  ;;  %v76_v36 = vmul.f32 %v70_v23, %v48_v31  ;;  %v77_v37 = vmul.f32 %v70_v23, %v49_v33  ;;  %v78_v38 = vmul.f32 %v70_v23, %v50_v35 }
  0x8d   :  { %79 = vst [vmem:[#allocation5] sm:$0x3f] %v71_v28 }
  0x8e   :  { %80 = vst [vmem:[#allocation5 + $0x8] sm:$0x3f] %v72_v29 }
  0x8f   :  { %81 = vst [vmem:[#allocation5 + $0x10] sm:$0x3f] %v73_v30 }
  0x90   :  { %82 = vst [vmem:[#allocation5 + $0x18] sm:$0x3f] %v74_v32 }
  0x91   :  { %83 = vst [vmem:[#allocation5 + $0x20] sm:$0x3f] %v75_v34 }
  0x92   :  { %84 = vst [vmem:[#allocation5 + $0x28] sm:$0x3f] %v76_v36 }
  0x93   :  { %85 = vst [vmem:[#allocation5 + $0x30] sm:$0x3f] %v77_v37 }
  0x94   :  { %86 = vst [vmem:[#allocation5 + $0x38] sm:$0x3f] %v78_v38 }
  0x95   :  { %97 = dma.vmem_to_hbm [thread:$0]  %s93_s1, 1024, %s95_s22, [#allocation4]  }
  0x96   :  { %160 = dma.done.wait [#allocation4], 1024  }
  0x97   :  { %161 = vsyncadd [#allocation4], 4294966272 }
  0x98   :  { %102 = vsyncpa [#allocation3], 1 }
  0x99   :  { %103 = vsyncpa [#allocation4], 1 }

</bundles_post_ra>
